<compile_context>
chip_gen: v7x
topology: tpu7x:2x2x1
jax: 0.10.0
libtpu: 0.0.40
codegen_flags: <defaults>
</compile_context>

<pallas_src>
import jax
import jax.numpy as jnp
from jax.experimental import pallas as pl
from jax.experimental.pallas import tpu as pltpu

HIDDEN = 128
SUBLANE = 8
MAX_BATCH_TILE = 4096  # sweepable; per-row bytes are tiny so large tiles amortize step overhead


def _round_up(n, m):
    return ((n + m - 1) // m) * m


def _cdiv(a, b):
    return (a + b - 1) // b


def _actor_critic_kernel(x_ref, w1_ref, b1_ref, wh_ref, bh_ref, out_ref):
    # Stage 1: x @ W1 on the MXU in bf16 (f32 accumulation), bias + ReLU in f32 on the VPU.
    x = x_ref[...].astype(jnp.bfloat16)
    h = jnp.dot(x, w1_ref[...], preferred_element_type=jnp.float32)
    h = jnp.maximum(h + b1_ref[...], 0.0)
    # Stage 2: fused actor+critic heads, one small-N matmul, packed [tb, round_up(out+1, 8)] output.
    out = jnp.dot(h.astype(jnp.bfloat16), wh_ref[...],
                  preferred_element_type=jnp.float32) + bh_ref[...]
    out_ref[...] = out.astype(out_ref.dtype)


@jax.jit
def actor_critic_forward(x, w1, b1, wa, ba, wc, bc):
    """x: [B, input_dim]. Returns (actor_logits [B, output_dim], value [B, 1])."""
    batch, input_dim = x.shape
    output_dim = wa.shape[1]
    n_heads = output_dim + 1                 # actor logits ++ critic value
    n_out = _round_up(n_heads, SUBLANE)      # small packed output width (full-dim block)

    f32, bf16 = jnp.float32, jnp.bfloat16

    # --- balanced batch tiling; >= 2 tiles when possible so both v7x TensorCores get work ---
    b8 = _round_up(batch, SUBLANE)
    num_tiles = max(_cdiv(b8, MAX_BATCH_TILE), min(2, b8 // SUBLANE))
    if num_tiles > 1 and num_tiles % 2:
        num_tiles += 1                       # keep tile count a multiple of the v7x TC count
    tb = _round_up(_cdiv(b8, num_tiles), SUBLANE)
    num_tiles = _cdiv(b8, tb)
    b_pad = num_tiles * tb

    # x goes in with its NATIVE contraction dim and dtype (no padded/cast HBM copy);
    # only the batch tail (< tb rows) is zero-padded when needed.
    x_in = x if b_pad == batch else jnp.zeros((b_pad, input_dim), x.dtype).at[:batch].set(x)

    # Weights/biases are tiny and VMEM-resident across all grid steps; cast weights to bf16 here.
    w1_b = w1.astype(bf16)                                    # [input_dim, 128]
    b1_f = b1.reshape(1, HIDDEN).astype(f32)                  # [1, 128]
    wh = jnp.concatenate([wa, wc], axis=1).astype(bf16)       # [128, out+1] fused heads
    wh_p = jnp.zeros((HIDDEN, n_out), bf16).at[:, :n_heads].set(wh)
    bh = jnp.concatenate([ba.reshape(1, -1), bc.reshape(1, -1)], axis=1).astype(f32)
    bh_p = jnp.zeros((1, n_out), f32).at[:, :n_heads].set(bh)

    flops = 2 * b_pad * input_dim * HIDDEN + 2 * b_pad * HIDDEN * n_out
    bytes_accessed = (x_in.size * x_in.dtype.itemsize
                      + w1_b.size * 2 + b1_f.size * 4
                      + wh_p.size * 2 + bh_p.size * 4
                      + b_pad * n_out * 4)

    packed = pl.pallas_call(
        _actor_critic_kernel,
        grid=(num_tiles,),
        in_specs=[
            pl.BlockSpec((tb, input_dim), lambda i: (i, 0)),      # x: native K, batch-tiled, double-buffered
            pl.BlockSpec((input_dim, HIDDEN), lambda i: (0, 0)),  # W1: VMEM-resident across steps
            pl.BlockSpec((1, HIDDEN), lambda i: (0, 0)),          # b1
            pl.BlockSpec((HIDDEN, n_out), lambda i: (0, 0)),      # fused head weights
            pl.BlockSpec((1, n_out), lambda i: (0, 0)),           # fused head bias
        ],
        out_specs=pl.BlockSpec((tb, n_out), lambda i: (i, 0)),    # small packed output (full-dim last dim)
        out_shape=jax.ShapeDtypeStruct((b_pad, n_out), f32),
        compiler_params=pltpu.CompilerParams(
            dimension_semantics=("parallel",),                    # batch tiles across v7x's 2 TCs
        ),
        cost_estimate=pl.CostEstimate(flops=flops, transcendentals=0,
                                      bytes_accessed=bytes_accessed),
    )(x_in, w1_b, b1_f, wh_p, bh_p)

    # Unpack: actor logits are columns [0, out), critic value is column `out`.
    actor = packed[:batch, :output_dim]
    critic = packed[:batch, output_dim:output_dim + 1]
    return actor, critic


def init_params(key, input_dim, output_dim):
    """Deterministic PyTorch-Linear-style init (uniform +/- 1/sqrt(fan_in)),
    with weights stored as [in, out] for the kernel."""
    k1, k2, k3, k4, k5, k6 = jax.random.split(key, 6)

    def uniform(k, shape, fan_in):
        bound = 1.0 / jnp.sqrt(jnp.float32(fan_in))
        return jax.random.uniform(k, shape, jnp.float32, -bound, bound)

    w1 = uniform(k1, (input_dim, HIDDEN), input_dim)
    b1 = uniform(k2, (1, HIDDEN), input_dim)
    wa = uniform(k3, (HIDDEN, output_dim), HIDDEN)
    ba = uniform(k4, (1, output_dim), HIDDEN)
    wc = uniform(k5, (HIDDEN, 1), HIDDEN)
    bc = uniform(k6, (1, 1), HIDDEN)
    return w1, b1, wa, ba, wc, bc


if __name__ == "__main__":
    key = jax.random.PRNGKey(0)
    k_x, k_p = jax.random.split(key)

    batch, input_dim, output_dim = 8, 16, 4   # small shapes consistent with the module
    x = jax.random.normal(k_x, (batch, input_dim), jnp.float32)
    params = init_params(k_p, input_dim, output_dim)

    actor_logits, value = actor_critic_forward(x, *params)
    jax.block_until_ready((actor_logits, value))

    # sanity check against plain JAX f32 reference (bf16 MXU path -> loosened tolerance)
    w1, b1, wa, ba, wc, bc = params
    h_ref = jnp.maximum(x @ w1 + b1, 0.0)
    a_ref = h_ref @ wa + ba
    c_ref = h_ref @ wc + bc
    assert actor_logits.shape == (batch, output_dim)
    assert value.shape == (batch, 1)
    assert jnp.allclose(actor_logits, a_ref, rtol=3e-2, atol=3e-2)
    assert jnp.allclose(value, c_ref, rtol=3e-2, atol=3e-2)

    print("KERNEL_OK")
</pallas_src>

<mosaic_0001>
module attributes {stable_mosaic.version = 11 : i64} {
  func.func @_actor_critic_kernel(%arg0: i32, %arg1: memref<8x16xf32, #tpu.memory_space<vmem>>, %arg2: memref<16x128xbf16, #tpu.memory_space<vmem>>, %arg3: memref<1x128xf32, #tpu.memory_space<vmem>>, %arg4: memref<128x8xbf16, #tpu.memory_space<vmem>>, %arg5: memref<1x8xf32, #tpu.memory_space<vmem>>, %arg6: memref<8x8xf32, #tpu.memory_space<vmem>>) attributes {dimension_semantics = [#tpu.dimension_semantics<parallel>], iteration_bounds = array<i64: 1>, scalar_prefetch = 0 : i64, scratch_operands = 0 : i64, tpu.core_type = #tpu.core_type<tc>, window_params = [{transform_indices = @transform_0, window_bounds = array<i64: 8, 16>}, {pipeline_mode = #tpu.pipeline_mode<synchronous>, transform_indices = @transform_1, window_bounds = array<i64: 16, 128>}, {pipeline_mode = #tpu.pipeline_mode<synchronous>, transform_indices = @transform_2, window_bounds = array<i64: 1, 128>}, {pipeline_mode = #tpu.pipeline_mode<synchronous>, transform_indices = @transform_3, window_bounds = array<i64: 128, 8>}, {pipeline_mode = #tpu.pipeline_mode<synchronous>, transform_indices = @transform_4, window_bounds = array<i64: 1, 8>}, {transform_indices = @transform_5, window_bounds = array<i64: 8, 8>}]} {
    %c0 = arith.constant 0 : index
    %c0_0 = arith.constant 0 : index
    %0 = vector.load %arg1[%c0, %c0_0] : memref<8x16xf32, #tpu.memory_space<vmem>>, vector<8x16xf32>
    %1 = arith.truncf %0 : vector<8x16xf32> to vector<8x16xbf16>
    %c0_1 = arith.constant 0 : index
    %c0_2 = arith.constant 0 : index
    %2 = vector.load %arg2[%c0_1, %c0_2] : memref<16x128xbf16, #tpu.memory_space<vmem>>, vector<16x128xbf16>
    %cst = arith.constant dense<0.000000e+00> : vector<8x128xf32>
    %3 = tpu.matmul %1, %2, %cst {dimension_numbers = #tpu.dot_dimension_numbers<[1], [0], [0], [1], [0, 0, 1, 1], [], []>} : vector<8x16xbf16>, vector<16x128xbf16>, vector<8x128xf32> -> vector<8x128xf32>
    %c0_3 = arith.constant 0 : index
    %c0_4 = arith.constant 0 : index
    %4 = vector.load %arg3[%c0_3, %c0_4] : memref<1x128xf32, #tpu.memory_space<vmem>>, vector<1x128xf32>
    %5 = vector.broadcast %4 : vector<1x128xf32> to vector<8x128xf32>
    %6 = arith.addf %3, %5 : vector<8x128xf32>
    %cst_5 = arith.constant 0.000000e+00 : f32
    %7 = vector.broadcast %cst_5 : f32 to vector<8x128xf32>
    %8 = arith.maximumf %6, %7 : vector<8x128xf32>
    %9 = arith.truncf %8 : vector<8x128xf32> to vector<8x128xbf16>
    %c0_6 = arith.constant 0 : index
    %c0_7 = arith.constant 0 : index
    %10 = vector.load %arg4[%c0_6, %c0_7] : memref<128x8xbf16, #tpu.memory_space<vmem>>, vector<128x8xbf16>
    %cst_8 = arith.constant dense<0.000000e+00> : vector<8x8xf32>
    %11 = tpu.matmul %9, %10, %cst_8 {dimension_numbers = #tpu.dot_dimension_numbers<[1], [0], [0], [1], [0, 0, 1, 1], [], []>} : vector<8x128xbf16>, vector<128x8xbf16>, vector<8x8xf32> -> vector<8x8xf32>
    %c0_9 = arith.constant 0 : index
    %c0_10 = arith.constant 0 : index
    %12 = vector.load %arg5[%c0_9, %c0_10] : memref<1x8xf32, #tpu.memory_space<vmem>>, vector<1x8xf32>
    %13 = vector.broadcast %12 : vector<1x8xf32> to vector<8x8xf32>
    %14 = arith.addf %11, %13 : vector<8x8xf32>
    %c0_11 = arith.constant 0 : index
    %c0_12 = arith.constant 0 : index
    %15 = vector.load %arg6[%c0_11, %c0_12] : memref<8x8xf32, #tpu.memory_space<vmem>>, vector<8x8xf32>
    tpu.vector_store %arg6[%c0_11, %c0_12], %14 {strides = array<i32>} : memref<8x8xf32, #tpu.memory_space<vmem>>, vector<8x8xf32>,
    return
  }
  func.func @transform_0(%arg0: i32) -> (i32, i32) {
    %c0_i32 = arith.constant 0 : i32
    %c0_i32_0 = arith.constant 0 : i32
    return %arg0, %c0_i32 : i32, i32
  }
  func.func @transform_1(%arg0: i32) -> (i32, i32) {
    %c0_i32 = arith.constant 0 : i32
    %c0_i32_0 = arith.constant 0 : i32
    %c0_i32_1 = arith.constant 0 : i32
    return %c0_i32, %c0_i32_0 : i32, i32
  }
  func.func @transform_2(%arg0: i32) -> (i32, i32) {
    %c0_i32 = arith.constant 0 : i32
    %c0_i32_0 = arith.constant 0 : i32
    %c0_i32_1 = arith.constant 0 : i32
    return %c0_i32, %c0_i32_0 : i32, i32
  }
  func.func @transform_3(%arg0: i32) -> (i32, i32) {
    %c0_i32 = arith.constant 0 : i32
    %c0_i32_0 = arith.constant 0 : i32
    %c0_i32_1 = arith.constant 0 : i32
    return %c0_i32, %c0_i32_0 : i32, i32
  }
  func.func @transform_4(%arg0: i32) -> (i32, i32) {
    %c0_i32 = arith.constant 0 : i32
    %c0_i32_0 = arith.constant 0 : i32
    %c0_i32_1 = arith.constant 0 : i32
    return %c0_i32, %c0_i32_0 : i32, i32
  }
  func.func @transform_5(%arg0: i32) -> (i32, i32) {
    %c0_i32 = arith.constant 0 : i32
    %c0_i32_0 = arith.constant 0 : i32
    return %arg0, %c0_i32 : i32, i32
  }
}

</mosaic_0001>

<bundles_post_ra>
// kernel: actor_critic_forward.1
= control target key start
LH: loop header
LB: loop body
LE: loop exit
PB: predicated region body
PF: predicated region fallthrough
CT: control target
= control target key end

     0   :  { %v261_v0 = vmov 0.0   ;;  %vm262_vm0 = vmmov 0   ;;  %vm38_vm1 = vcmask 130048   ;;  %vm195_vm2 = vcmask 64512   ;;  %s332_s1 = inlined_call_operand.vmem [shape: bf16[16,128], index: 1, kind: input, shape index: {}]   ;;  %s333_s0 = inlined_call_operand.vmem [shape: f32[8,16], index: 0, kind: input, shape index: {}]   ;;  %s334_s3 = inlined_call_operand.vmem [shape: bf16[128,8], index: 3, kind: input, shape index: {}]   ;;  %s335_s2 = inlined_call_operand.vmem [shape: f32[1,128], index: 2, kind: input, shape index: {}]   ;;  %s336_s4 = inlined_call_operand.vmem [shape: f32[1,8], index: 4, kind: input, shape index: {}]   ;;  %s337_s5 = inlined_call_operand.vmem [shape: f32[8,8], index: 5, kind: output, shape index: {}]  }
   0x1   :  { %224 = vmatprep.subr.bf16.mxu0 %v261_v0  ;;  %v252_v1 = vld [vmem:[%s332_s1] sm:$0xff]   ;;  %226 = vmatprep.mubr.msk.bf16.mxu0 %vm262_vm0, %v261_v0  ;;  %v254_v5 = vld [vmem:[%s334_s3 + $0x8] sm:$0xff]   ;;  %v255_v6 = vld [vmem:[%s334_s3 + $0x10] sm:$0xff]  }
   0x2   :  { %v21_v2 = vld [vmem:[%s333_s0] sm:$0xff]  ;;  %230 = vmatprep.subr.bf16.mxu1 %v261_v0  ;;  %246 = vmatprep.mubr.msk.bf16.mxu1 %vm262_vm0, %v261_v0  ;;  %v256_v7 = vld [vmem:[%s334_s3 + $0x18] sm:$0xff]   ;;  %v258_v9 = vld [vmem:[%s334_s3 + $0x28] sm:$0xff]  }
   0x3   :  { %225 = vmatpush3.bf16.msra.mxu0 %v252_v1  ;;  %v22_v3 = vpack.c.bf16 %v21_v2, %v21_v2  ;;  %v253_v4 = vld [vmem:[%s334_s3] sm:$0xff]   ;;  %v259_v10 = vld [vmem:[%s334_s3 + $0x30] sm:$0xff]   ;;  %v260_v11 = vld [vmem:[%s334_s3 + $0x38] sm:$0xff]  }
   0x4   :  { %231 = vmatpush3.bf16.msra.mxu1 %v253_v4  ;;  %v257_v8 = vld [vmem:[%s334_s3 + $0x20] sm:$0xff]  }
   0x5   :  { %232 = vmatprep.subr.bf16.mxu1 %v261_v0  ;;  %v201_v12 = vld [vmem:[%s335_s2] ss:$0 sm:$0xff] }
   0x6   :  { %227 = vmatmul.mubr.msk.bf16.vlgmr.msra.gmra.mrb[0].mxu0 %vm38_vm1, %v22_v3  ;;  %v204_v20 = vld [vmem:[%s336_s4] ss:$0 sm:$0xff] }
   0x8   :  { %233 = vmatpush3.bf16.msra.mxu1 %v254_v5 }
   0x9   :  { %234 = vmatprep.subr.bf16.mxu1 %v261_v0 }
   0xc   :  { %235 = vmatpush3.bf16.msra.mxu1 %v255_v6 }
   0xd   :  { %236 = vmatprep.subr.bf16.mxu1 %v261_v0 }
  0x10   :  { %237 = vmatpush3.bf16.msra.mxu1 %v256_v7 }
  0x11   :  { %238 = vmatprep.subr.bf16.mxu1 %v261_v0 }
  0x14   :  { %239 = vmatpush3.bf16.msra.mxu1 %v257_v8 }
  0x15   :  { %240 = vmatprep.subr.bf16.mxu1 %v261_v0 }
  0x18   :  { %241 = vmatpush3.bf16.msra.mxu1 %v258_v9 }
  0x19   :  { %242 = vmatprep.subr.bf16.mxu1 %v261_v0 }
  0x1c   :  { %243 = vmatpush3.bf16.msra.mxu1 %v259_v10 }
  0x1d   :  { %244 = vmatprep.subr.bf16.mxu1 %v261_v0 }
  0x20   :  { %245 = vmatpush3.bf16.msra.mxu1 %v260_v11 }
  0xd9   :  { %v76_v13 = vpop.f32.mrb[0].mxu0 }
  0xda   :  { %v77_v14 = vadd.f32 %v201_v12, %v76_v13  ;;  %v228_v15 = vpop.f32.mrb[1].mxu0 }
  0xdb   :  { %v79_v16 = vpop.f32.mrb[2].mxu0 }
  0xdc   :  { %v82_v17 = vmax.f32 %v77_v14, 0.0  ;;  %v229_v18 = vpop.f32.mrb[3].mxu0 }
  0xde   :  { %v83_v19 = vpack.c.bf16 %v82_v17, %v82_v17 }
  0xe0   :  { %247 = vmatmul.mubr.bf16.vlgmr.msra.gmra.mrb[0].mxu1 %v83_v19 }
 0x1b3   :  { %v189_v21 = vpop.f32.mrb[0].mxu1 }
 0x1b4   :  { %v190_v22 = vadd.f32 %v204_v20, %v189_v21  ;;  %v248_v23 = vpop.f32.mrb[1].mxu1 }
 0x1b5   :  { %v192_v24 = vpop.f32.mrb[2].mxu1 }
 0x1b6   :  { %196 = vst.msk [vmem:[%s337_s5] sm:$0xff] %vm195_vm2, %v190_v22  ;;  %v249_v25 = vpop.f32.mrb[3].mxu1 }

</bundles_post_ra>
